<compile_context>
chip_gen: v6e
topology: v6e:2x2x1
jax: 0.10.0
libtpu: 0.0.40
codegen_flags: <defaults>
</compile_context>

<pallas_src>
import functools

import jax
import jax.numpy as jnp
from jax.experimental import pallas as pl
from jax.experimental.pallas import tpu as pltpu

INPUT_SIZE = 2
HIDDEN_SIZE = 10
OUTPUT_SIZE = 2
AUG = HIDDEN_SIZE + 1          # hidden + carried "ones" row (bias folding)
MAX_TILE_B = 32768             # batch tile on the lane axis; multiple of 128


def _round_up(n, m):
    return ((n + m - 1) // m) * m


def _mlp_logsoftmax_kernel(x_ref, w1_ref, b1_ref, w2_ref, w3_ref, o_ref):
    # x_ref: (INPUT_SIZE, T) -- batch on lanes (lane-dense loads/stores).
    # fc1 on the MXU; b1e's extra row produces a constant "ones" row that carries
    # the fc2/fc3 biases through the subsequent matmuls (relu(1) == 1).
    h1 = jnp.dot(w1_ref[...], x_ref[...], preferred_element_type=jnp.float32)
    h1 = jnp.maximum(h1 + b1_ref[...], 0.0)                                  # (AUG, T)

    # fc2 + relu; W2a = [[W2, b2], [e_last]] keeps the ones row alive.
    h2 = jnp.maximum(
        jnp.dot(w2_ref[...], h1, preferred_element_type=jnp.float32), 0.0)   # (AUG, T)

    # fc3; W3a = [W3, b3].
    logits = jnp.dot(w3_ref[...], h2, preferred_element_type=jnp.float32)    # (2, T)

    # 2-class log-softmax, softplus form (stable): out0 = -softplus(l1 - l0),
    # out1 = -softplus(l0 - l1) with softplus(t) = max(t, 0) + log(1 + exp(-|t|)).
    d = logits[0:1, :] - logits[1:2, :]
    lse_off = jnp.log(1.0 + jnp.exp(-jnp.abs(d)))
    o_ref[0:1, :] = jnp.minimum(d, 0.0) - lse_off
    o_ref[1:2, :] = jnp.minimum(-d, 0.0) - lse_off


def _augment_params(p):
    # fc1: W1e (AUG, 2) = [W1; 0],  b1e (AUG, 1) = [b1; 1]  -> h1 row AUG-1 == 1.
    w1e = jnp.concatenate([p["W1"], jnp.zeros((1, INPUT_SIZE), jnp.float32)], axis=0)
    b1e = jnp.concatenate([p["b1"], jnp.ones((1, 1), jnp.float32)], axis=0)
    # fc2: W2a (AUG, AUG) = [[W2, b2], [e_last]] (e_last keeps the ones row alive).
    e_last = jnp.zeros((1, AUG), jnp.float32).at[0, AUG - 1].set(1.0)
    w2a = jnp.concatenate(
        [jnp.concatenate([p["W2"], p["b2"]], axis=1), e_last], axis=0)
    # fc3: W3a (2, AUG) = [W3, b3].
    w3a = jnp.concatenate([p["W3"], p["b3"]], axis=1)
    return w1e, b1e, w2a, w3a


def _choose_tiling(batch, max_tile_b):
    """Pick a lane tile (multiple of 128, <= max_tile_b) minimizing batch padding."""
    b128 = _round_up(max(batch, 1), 128)
    n_tiles = pl.cdiv(b128, max_tile_b)
    tile_b = _round_up(pl.cdiv(batch, n_tiles), 128)
    return tile_b, n_tiles * tile_b


def _run_kernel(xt, w1e, b1e, w2a, w3a, tile_b):
    """xt: (INPUT_SIZE, b_pad) f32 with b_pad % tile_b == 0 -> (OUTPUT_SIZE, b_pad)."""
    b_pad = xt.shape[1]
    full = lambda i: (0, 0)
    cost = pl.CostEstimate(
        flops=380 * b_pad,           # 2*(AUG*2 + AUG*AUG + 2*AUG) + epilogue, per column
        transcendentals=2 * b_pad,   # one exp + one log per batch element
        bytes_accessed=16 * b_pad,   # 8 B in + 8 B out per batch element (weights ~0)
    )
    return pl.pallas_call(
        _mlp_logsoftmax_kernel,
        out_shape=jax.ShapeDtypeStruct((OUTPUT_SIZE, b_pad), jnp.float32),
        grid_spec=pltpu.PrefetchScalarGridSpec(
            num_scalar_prefetch=0,
            grid=(b_pad // tile_b,),
            in_specs=[
                pl.BlockSpec((INPUT_SIZE, tile_b), lambda i: (0, i)),  # x^T, batch-tiled
                pl.BlockSpec((AUG, INPUT_SIZE), full),                 # W1e (resident)
                pl.BlockSpec((AUG, 1), full),                          # b1e (resident)
                pl.BlockSpec((AUG, AUG), full),                        # W2a (resident)
                pl.BlockSpec((OUTPUT_SIZE, AUG), full),                # W3a (resident)
            ],
            out_specs=pl.BlockSpec((OUTPUT_SIZE, tile_b), lambda i: (0, i)),
        ),
        compiler_params=pltpu.CompilerParams(
            # TODO(synk): on v7x consider pltpu.CORE_PARALLEL / core_map to guarantee
            # the batch-tile axis is sharded across both TensorCores.
            dimension_semantics=("parallel",),
            vmem_limit_bytes=32 * 1024 * 1024,
        ),
        cost_estimate=cost,
    )(xt, w1e, b1e, w2a, w3a)


@functools.partial(jax.jit, static_argnames=("max_tile_b",))
def net_forward(x, params, *, max_tile_b=MAX_TILE_B):
    """PyTorch-convention API: x (B, INPUT_SIZE) f32 -> log-probs (B, OUTPUT_SIZE)."""
    B = x.shape[0]
    tile_b, b_pad = _choose_tiling(B, max_tile_b)
    # Pad + transpose under the same jit as the kernel so XLA can overlap them.
    xt = jnp.zeros((INPUT_SIZE, b_pad), jnp.float32).at[:, :B].set(
        x.astype(jnp.float32).T)
    w1e, b1e, w2a, w3a = _augment_params(params)
    out_t = _run_kernel(xt, w1e, b1e, w2a, w3a, tile_b)
    return out_t[:, :B].T


@functools.partial(jax.jit, static_argnames=("max_tile_b",))
def net_forward_feature_major(xt, params, *, max_tile_b=MAX_TILE_B):
    """Feature-major API (no transposes): xt (INPUT_SIZE, B) -> (OUTPUT_SIZE, B)."""
    B = xt.shape[1]
    tile_b, b_pad = _choose_tiling(B, max_tile_b)
    xp = jnp.zeros((INPUT_SIZE, b_pad), jnp.float32).at[:, :B].set(
        xt.astype(jnp.float32))
    w1e, b1e, w2a, w3a = _augment_params(params)
    return _run_kernel(xp, w1e, b1e, w2a, w3a, tile_b)[:, :B]


def init_params(key):
    """Deterministic init mimicking nn.Linear's U(-1/sqrt(fan_in), +1/sqrt(fan_in)).

    Weights in PyTorch layout (out_features, in_features); biases (out, 1).
    """
    ks = jax.random.split(key, 6)

    def linear(kw, kb, fan_in, fan_out):
        bound = 1.0 / jnp.sqrt(jnp.float32(fan_in))
        W = jax.random.uniform(kw, (fan_out, fan_in), jnp.float32, -bound, bound)
        b = jax.random.uniform(kb, (fan_out, 1), jnp.float32, -bound, bound)
        return W, b

    W1, b1 = linear(ks[0], ks[1], INPUT_SIZE, HIDDEN_SIZE)
    W2, b2 = linear(ks[2], ks[3], HIDDEN_SIZE, HIDDEN_SIZE)
    W3, b3 = linear(ks[4], ks[5], HIDDEN_SIZE, OUTPUT_SIZE)
    return {"W1": W1, "b1": b1, "W2": W2, "b2": b2, "W3": W3, "b3": b3}


def net_forward_ref(x, p):
    h1 = jnp.maximum(x @ p["W1"].T + p["b1"][:, 0], 0.0)
    h2 = jnp.maximum(h1 @ p["W2"].T + p["b2"][:, 0], 0.0)
    logits = h2 @ p["W3"].T + p["b3"][:, 0]
    return jax.nn.log_softmax(logits, axis=1)


if __name__ == "__main__":
    key = jax.random.PRNGKey(0)
    k_param, k_x = jax.random.split(key)
    params = init_params(k_param)

    batch = 8
    x = jax.random.normal(k_x, (batch, INPUT_SIZE), dtype=jnp.float32)

    out = jax.block_until_ready(net_forward(x, params))
    ref = net_forward_ref(x, params)
    assert out.shape == (batch, OUTPUT_SIZE)
    assert jnp.allclose(out, ref, atol=1e-4, rtol=1e-4), float(jnp.max(jnp.abs(out - ref)))

    # Non-multiple-of-128 batch exercises the pad / slice path.
    x2 = jax.random.normal(jax.random.PRNGKey(1), (137, INPUT_SIZE), dtype=jnp.float32)
    out2 = jax.block_until_ready(net_forward(x2, params))
    ref2 = net_forward_ref(x2, params)
    assert jnp.allclose(out2, ref2, atol=1e-4, rtol=1e-4)

    # Feature-major entry point (avoids the wrapper-side HBM transpose round trips).
    out_fm = jax.block_until_ready(net_forward_feature_major(x.T, params))
    assert jnp.allclose(out_fm.T, ref, atol=1e-4, rtol=1e-4)

    print("KERNEL_OK")
</pallas_src>

<mosaic_0001>
module attributes {stable_mosaic.version = 11 : i64} {
  func.func @_mlp_logsoftmax_kernel(%arg0: i32, %arg1: memref<2x128xf32, #tpu.memory_space<vmem>>, %arg2: memref<11x2xf32, #tpu.memory_space<vmem>>, %arg3: memref<11x1xf32, #tpu.memory_space<vmem>>, %arg4: memref<11x11xf32, #tpu.memory_space<vmem>>, %arg5: memref<2x11xf32, #tpu.memory_space<vmem>>, %arg6: memref<2x128xf32, #tpu.memory_space<vmem>>) attributes {dimension_semantics = [#tpu.dimension_semantics<parallel>], iteration_bounds = array<i64: 1>, scalar_prefetch = 0 : i64, scratch_operands = 0 : i64, tpu.core_type = #tpu.core_type<tc>, window_params = [{transform_indices = @transform_0, window_bounds = array<i64: 2, 128>}, {pipeline_mode = #tpu.pipeline_mode<synchronous>, transform_indices = @transform_1, window_bounds = array<i64: 11, 2>}, {pipeline_mode = #tpu.pipeline_mode<synchronous>, transform_indices = @transform_2, window_bounds = array<i64: 11, 1>}, {pipeline_mode = #tpu.pipeline_mode<synchronous>, transform_indices = @transform_3, window_bounds = array<i64: 11, 11>}, {pipeline_mode = #tpu.pipeline_mode<synchronous>, transform_indices = @transform_4, window_bounds = array<i64: 2, 11>}, {transform_indices = @transform_5, window_bounds = array<i64: 2, 128>}]} {
    %c0 = arith.constant 0 : index
    %c0_0 = arith.constant 0 : index
    %0 = vector.load %arg2[%c0, %c0_0] : memref<11x2xf32, #tpu.memory_space<vmem>>, vector<11x2xf32>
    %c0_1 = arith.constant 0 : index
    %c0_2 = arith.constant 0 : index
    %1 = vector.load %arg1[%c0_1, %c0_2] : memref<2x128xf32, #tpu.memory_space<vmem>>, vector<2x128xf32>
    %cst = arith.constant dense<0.000000e+00> : vector<11x128xf32>
    %2 = tpu.matmul %0, %1, %cst {dimension_numbers = #tpu.dot_dimension_numbers<[1], [0], [0], [1], [0, 0, 1, 1], [], []>} : vector<11x2xf32>, vector<2x128xf32>, vector<11x128xf32> -> vector<11x128xf32>
    %c0_3 = arith.constant 0 : index
    %c0_4 = arith.constant 0 : index
    %3 = vector.load %arg3[%c0_3, %c0_4] : memref<11x1xf32, #tpu.memory_space<vmem>>, vector<11x1xf32>
    %4 = vector.broadcast %3 : vector<11x1xf32> to vector<11x128xf32>
    %5 = arith.addf %2, %4 : vector<11x128xf32>
    %cst_5 = arith.constant 0.000000e+00 : f32
    %6 = vector.broadcast %cst_5 : f32 to vector<11x128xf32>
    %7 = arith.maximumf %5, %6 : vector<11x128xf32>
    %c0_6 = arith.constant 0 : index
    %c0_7 = arith.constant 0 : index
    %8 = vector.load %arg4[%c0_6, %c0_7] : memref<11x11xf32, #tpu.memory_space<vmem>>, vector<11x11xf32>
    %cst_8 = arith.constant dense<0.000000e+00> : vector<11x128xf32>
    %9 = tpu.matmul %8, %7, %cst_8 {dimension_numbers = #tpu.dot_dimension_numbers<[1], [0], [0], [1], [0, 0, 1, 1], [], []>} : vector<11x11xf32>, vector<11x128xf32>, vector<11x128xf32> -> vector<11x128xf32>
    %cst_9 = arith.constant 0.000000e+00 : f32
    %10 = vector.broadcast %cst_9 : f32 to vector<11x128xf32>
    %11 = arith.maximumf %9, %10 : vector<11x128xf32>
    %c0_10 = arith.constant 0 : index
    %c0_11 = arith.constant 0 : index
    %12 = vector.load %arg5[%c0_10, %c0_11] : memref<2x11xf32, #tpu.memory_space<vmem>>, vector<2x11xf32>
    %cst_12 = arith.constant dense<0.000000e+00> : vector<2x128xf32>
    %13 = tpu.matmul %12, %11, %cst_12 {dimension_numbers = #tpu.dot_dimension_numbers<[1], [0], [0], [1], [0, 0, 1, 1], [], []>} : vector<2x11xf32>, vector<11x128xf32>, vector<2x128xf32> -> vector<2x128xf32>
    %14 = vector.extract_strided_slice %13 {offsets = [0, 0], sizes = [1, 128], strides = [1, 1]} : vector<2x128xf32> to vector<1x128xf32>
    %15 = vector.extract_strided_slice %13 {offsets = [1, 0], sizes = [1, 128], strides = [1, 1]} : vector<2x128xf32> to vector<1x128xf32>
    %16 = arith.subf %14, %15 : vector<1x128xf32>
    %17 = math.absf %16 : vector<1x128xf32>
    %cst_13 = arith.constant 0.000000e+00 : f32
    %18 = vector.broadcast %cst_13 : f32 to vector<1x128xf32>
    %19 = arith.subf %18, %17 : vector<1x128xf32>
    %20 = math.exp %19 : vector<1x128xf32>
    %cst_14 = arith.constant 1.000000e+00 : f32
    %21 = vector.broadcast %cst_14 : f32 to vector<1x128xf32>
    %22 = arith.addf %21, %20 : vector<1x128xf32>
    %23 = math.log %22 : vector<1x128xf32>
    %cst_15 = arith.constant 0.000000e+00 : f32
    %24 = vector.broadcast %cst_15 : f32 to vector<1x128xf32>
    %25 = arith.minimumf %16, %24 : vector<1x128xf32>
    %26 = arith.subf %25, %23 : vector<1x128xf32>
    %c0_16 = arith.constant 0 : index
    %c0_17 = arith.constant 0 : index
    %27 = vector.load %arg6[%c0_16, %c0_17] : memref<2x128xf32, #tpu.memory_space<vmem>>, vector<1x128xf32>
    tpu.vector_store %arg6[%c0_16, %c0_17], %26 {strides = array<i32>} : memref<2x128xf32, #tpu.memory_space<vmem>>, vector<1x128xf32>,
    %cst_18 = arith.constant 0.000000e+00 : f32
    %28 = vector.broadcast %cst_18 : f32 to vector<1x128xf32>
    %29 = arith.subf %28, %16 : vector<1x128xf32>
    %cst_19 = arith.constant 0.000000e+00 : f32
    %30 = vector.broadcast %cst_19 : f32 to vector<1x128xf32>
    %31 = arith.minimumf %29, %30 : vector<1x128xf32>
    %32 = arith.subf %31, %23 : vector<1x128xf32>
    %c1 = arith.constant 1 : index
    %c0_20 = arith.constant 0 : index
    %33 = vector.load %arg6[%c1, %c0_20] : memref<2x128xf32, #tpu.memory_space<vmem>>, vector<1x128xf32>
    tpu.vector_store %arg6[%c1, %c0_20], %32 {strides = array<i32>} : memref<2x128xf32, #tpu.memory_space<vmem>>, vector<1x128xf32>,
    return
  }
  func.func @transform_0(%arg0: i32) -> (i32, i32) {
    %c0_i32 = arith.constant 0 : i32
    %c0_i32_0 = arith.constant 0 : i32
    return %c0_i32, %arg0 : i32, i32
  }
  func.func @transform_1(%arg0: i32) -> (i32, i32) {
    %c0_i32 = arith.constant 0 : i32
    %c0_i32_0 = arith.constant 0 : i32
    %c0_i32_1 = arith.constant 0 : i32
    return %c0_i32, %c0_i32_0 : i32, i32
  }
  func.func @transform_2(%arg0: i32) -> (i32, i32) {
    %c0_i32 = arith.constant 0 : i32
    %c0_i32_0 = arith.constant 0 : i32
    %c0_i32_1 = arith.constant 0 : i32
    return %c0_i32, %c0_i32_0 : i32, i32
  }
  func.func @transform_3(%arg0: i32) -> (i32, i32) {
    %c0_i32 = arith.constant 0 : i32
    %c0_i32_0 = arith.constant 0 : i32
    %c0_i32_1 = arith.constant 0 : i32
    return %c0_i32, %c0_i32_0 : i32, i32
  }
  func.func @transform_4(%arg0: i32) -> (i32, i32) {
    %c0_i32 = arith.constant 0 : i32
    %c0_i32_0 = arith.constant 0 : i32
    %c0_i32_1 = arith.constant 0 : i32
    return %c0_i32, %c0_i32_0 : i32, i32
  }
  func.func @transform_5(%arg0: i32) -> (i32, i32) {
    %c0_i32 = arith.constant 0 : i32
    %c0_i32_0 = arith.constant 0 : i32
    return %c0_i32, %arg0 : i32, i32
  }
}

</mosaic_0001>

<bundles_post_ra>
// kernel: net_forward.1
= control target key start
LH: loop header
LB: loop body
LE: loop exit
PB: predicated region body
PF: predicated region fallthrough
CT: control target
= control target key end

     0   :  { %vm42_vm0 = vcmask 1041408   ;;  %vm35_vm1 = vcmask 15360   ;;  %v357_v3 = vmov 0   ;;  %vm125_vm2 = vcmask 89088   ;;  %s426_s0 = inlined_call_operand.vmem [shape: f32[2,128], index: 0, kind: input, shape index: {}]   ;;  %s427_s1 = inlined_call_operand.vmem [shape: f32[11,2], index: 1, kind: input, shape index: {}]   ;;  %s428_s2 = inlined_call_operand.vmem [shape: f32[11,1], index: 2, kind: input, shape index: {}]   ;;  %s429_s3 = inlined_call_operand.vmem [shape: f32[11,11], index: 3, kind: input, shape index: {}]   ;;  %s430_s4 = inlined_call_operand.vmem [shape: f32[2,11], index: 4, kind: input, shape index: {}]   ;;  %s431_s5 = inlined_call_operand.vmem [shape: f32[2,128], index: 5, kind: output, shape index: {}]  }
   0x1   :  { %v22_v0 = vld [vmem:[%s426_s0] sm:$0x3]  ;;  %v21_v2 = vld [vmem:[%s427_s1 + $0x8] sm:$0x7]  ;;  %352 = vset.pattern.permute.xlu0 %v357_v3  ;;  %vm132_vm3 = vcmask 1042432   ;;  %v358_v16 = vmov 0.0  }
   0x2   :  { %v20_v1 = vld [vmem:[%s427_s1] sm:$0xff]  ;;  %330 = vmatprep.subr.msk.mxu0 %vm42_vm0, %v22_v0  ;;  %v24_v4 = vld [vmem:[%s428_s2 + $0x8] sm:$0x7]  ;;  %vm359_vm4 = vmmov 0  }
   0x3   :  { %332 = vmatprep.mubr.msk.f32.mxu0 %vm35_vm1, %v20_v1  ;;  %331 = vmatpush3.msk.msra.mxu0 %vm42_vm0, %v22_v0  ;;  %v23_v5 = vld [vmem:[%s428_s2] sm:$0xff]  ;;  %v124_v15 = vld [vmem:[%s429_s3 + $0x8] sm:$0x7] }
   0x4   :  { %32 = vperm.xlu0 %352, %v24_v4   ;;  %333 = vmatmul.mubr.msk.f32.vlgmr.msra.gmra.mxu0 %vm35_vm1, %v21_v2  ;;  %v123_v6 = vld [vmem:[%s429_s3] sm:$0xff] }
   0x5   :  { %339 = vmatprep.mubr.msk.f32.mxu1 %vm125_vm2, %v123_v6  ;;  %342 = vmatprep.subr.mxu0 %v358_v16  ;;  %v213_v21 = vld [vmem:[%s430_s4] sm:$0x3] }
   0x6   :  { %346 = vmatprep.mubr.msk.f32.mxu0 %vm359_vm4, %v358_v16 }
   0x8   :  { %27 = vperm.xlu0 %352, %v23_v5  }
  0x7f   :  { %v33_v7 = vpop.permute.xlu0 %32 }
  0x83   :  { %v28_v10 = vpop.permute.xlu0 %27 }
  0xc4   :  { %v334_v8 = vpop.f32.mrf.mxu0 }
  0xc5   :  { %v118_v9 = vadd.f32 %v334_v8, %v33_v7 }
  0xc6   :  { %v112_v11 = vpop.f32.mrf.mxu0 }
  0xc7   :  { %v122_v12 = vmax.f32 %v118_v9, 0.0  ;;  %v113_v13 = vadd.f32 %v112_v11, %v28_v10 }
  0xc9   :  { %v121_v14 = vmax.f32 %v113_v13, 0.0  ;;  %335 = vmatprep.subr.msk.mxu1 %vm132_vm3, %v122_v12 }
  0xca   :  { %336 = vmatpush3.msk.msra.mxu1 %vm132_vm3, %v122_v12 }
  0xcb   :  { %337 = vmatprep.subr.mxu1 %v121_v14 }
  0xcc   :  { %338 = vmatpush3.msra.mxu1 %v121_v14 }
  0xcd   :  { %340 = vmatmul.mubr.msk.f32.vlgmr.msra.gmra.mxu1 %vm125_vm2, %v124_v15 }
 0x18d   :  { %v341_v17 = vpop.f32.mrf.mxu1 }
 0x18e   :  { %v212_v18 = vmax.f32 %v341_v17, 0.0 }
 0x18f   :  { %v202_v19 = vpop.f32.mrf.mxu1 }
 0x190   :  { %v211_v20 = vmax.f32 %v202_v19, 0.0  ;;  %343 = vmatpush3.msk.msra.mxu0 %vm132_vm3, %v212_v18 }
 0x191   :  { %344 = vmatprep.subr.mxu0 %v358_v16 }
 0x192   :  { %345 = vmatpush3.msra.mxu0 %v211_v20 }
 0x193   :  { %347 = vmatmul.mubr.msk.f32.vlgmr.msra.gmra.mxu0 %vm125_vm2, %v213_v21 }
 0x253   :  { %v286_v22 = vpop.f32.mrf.mxu0 }
 0x254   :  { %v291_v23 = vrot.slane %v286_v22, 1 }
 0x255   :  { %v348_v24 = vpop.f32.mrf.mxu0 }
 0x256   :  { %v293_v25 = vsub.f32 %v286_v22, %v291_v23 }
 0x258   :  { %v294_v26 = vand.u32 2147483647, %v293_v25  ;;  %v304_v31 = vsub.f32 0.0, %v293_v25  ;;  %v301_v34 = vmin.f32 %v293_v25, 0.0 }
 0x25a   :  { %v295_v27 = vsub.f32 0.0, %v294_v26  ;;  %v305_v35 = vmin.f32 %v304_v31, 0.0 }
 0x25c   :  { %v296_v28 = vmul.f32 1.442695, %v295_v27 }
 0x25e   :  { %353 = vpow2.f32 %v296_v28 }
 0x26b   :  { %v354_v29 = vpop.eup %353 }
 0x26c   :  { %v298_v30 = vadd.f32 1.0, %v354_v29 }
 0x26e   :  { %355 = vlog2.f32 %v298_v30 }
 0x27b   :  { %v356_v32 = vpop.eup %355 }
 0x27c   :  { %v300_v33 = vmul.f32 0.6931472, %v356_v32 }
 0x27e   :  { %v302_v36 = vsub.f32 %v301_v34, %v300_v33  ;;  %v306_v37 = vsub.f32 %v305_v35, %v300_v33 }
 0x280   :  { %303 = vst [vmem:[%s431_s5] sm:$0x1] %v302_v36  ;;  %307 = vst [vmem:[%s431_s5 + $0x1] sm:$0x1] %v306_v37 }

</bundles_post_ra>
